<compile_context>
chip_gen: v6e
topology: v6e:2x2x1
jax: 0.10.0
libtpu: 0.0.40
codegen_flags: <defaults>
</compile_context>

<pallas_src>
import jax
import jax.numpy as jnp
from jax.experimental import pallas as pl
from jax.experimental.pallas import tpu as pltpu

HIDDEN = 32            # args.hidden_dim (small, for the synthetic example)
NODE_IN = 76           # 'pdb' / 'Protein' node feature width
EDGE_IN_RAW = 196      # raw edge feature width before chain-embedding concat
CHAIN_EMB_DIM = 16     # nn.Embedding(2, 16)
EDGE_IN = EDGE_IN_RAW + CHAIN_EMB_DIM   # 212 ('pdb': 196 + 16)
VIRTUAL_VOCAB = 30     # nn.Embedding(30, hidden_dim)
VOCAB = 33             # MLPDecoder readout width (tokenizer vocab)

# padded (lane/sublane aligned) kernel-side widths
H_PAD = 128            # hidden 32 -> 128 lanes
NODE_K_PAD = 128       # node contraction 76 -> 128
EDGE_K_PAD = 256       # edge contraction 196(+1 cf) -> 256
V_PAD = 128            # decoder vocab 33 -> 128 lanes

TM_MAX = 2048          # row-tile cap (<=2 MiB/slab; fits 32 MiB scoped VMEM on all gens)
ROW_ALIGN = 16         # bf16 sublane packing -> keep row pads/tiles multiples of 16


def _round_up(n, m):
    return ((n + m - 1) // m) * m


def _cdiv(a, b):
    return -(-a // b)


def _pad2(a, rows, cols):
    r, c = a.shape
    return jnp.pad(a, ((0, rows - r), (0, cols - c)))


def _pick_tile(n_rows, tm_max=TM_MAX, align=ROW_ALIGN):
    """Row padding + tile + grid. Ensures >=2 grid steps when n is moderate so
    dimension_semantics=('parallel',) shards rows across v7x's two TensorCores.
    The last block may be ragged (grid = cdiv); safe because rows are independent."""
    n_al = _round_up(max(n_rows, 1), align)
    tm = min(tm_max, n_al)
    if n_al > align and _cdiv(n_al, tm) < 2:
        tm = max(align, _round_up(_cdiv(n_al, 2), align))
    return n_al, tm, _cdiv(n_al, tm)


# ---------------------------------------------------------------------------
# Pallas kernels
# ---------------------------------------------------------------------------
def _node_decoder_kernel(x_ref, w1_ref, b1_ref, wf_ref, bf_ref, logits_ref):
    """Fused node_embedding (Linear -> BN(identity at init) -> ReLU) + [Linear folded
    with] MLPDecoder Linear.  Inputs/weights are bf16, accumulation and biases f32.
    log_softmax over the 33 real columns is done exactly in the JAX wrapper."""
    h = jnp.dot(x_ref[...], w1_ref[...], preferred_element_type=jnp.float32) + b1_ref[...]
    h = jnp.maximum(h, 0.0)                              # BN at init is identity
    # TODO(synk): StructureEncoder would refine h between the two Linears; its source is
    # not provided, which is what makes the offline W2 @ Wd fold legal here.
    logits = jnp.dot(h.astype(jnp.bfloat16), wf_ref[...],
                     preferred_element_type=jnp.float32) + bf_ref[...]
    logits_ref[...] = logits.astype(logits_ref.dtype)


def _edge_mlp_kernel(x_ref, w1_ref, b1_ref, w2_ref, b2_ref, o_ref):
    """edge_embedding with the chain-embedding gather+concat folded into the matmul:
    x column 196 carries cf (0/1) and row 196 of W1 carries the chain delta; b1 already
    contains the chain-0 contribution."""
    h = jnp.dot(x_ref[...], w1_ref[...], preferred_element_type=jnp.float32) + b1_ref[...]
    h = jnp.maximum(h, 0.0)
    o = jnp.dot(h.astype(jnp.bfloat16), w2_ref[...],
                preferred_element_type=jnp.float32) + b2_ref[...]
    o_ref[...] = o.astype(o_ref.dtype)   # bf16 slab; only the encoder would consume it


# ---------------------------------------------------------------------------
# Wrappers (row-tiled grid, lane-dense padded shapes, parallel semantics)
# ---------------------------------------------------------------------------
def node_and_decode(x_raw, nd_p, *, tm_max=TM_MAX):
    """x_raw: (N, 76) -> (log_probs (N,33), logits (N,33))."""
    w1, b1, wf, bf = nd_p
    n = x_raw.shape[0]
    k_pad = w1.shape[0]
    n_al, tm, steps = _pick_tile(n, tm_max)
    x = jnp.pad(x_raw, ((0, n_al - n), (0, k_pad - x_raw.shape[1]))).astype(jnp.bfloat16)
    full = lambda a: pl.BlockSpec(a.shape, lambda i: (0, 0))
    logits_pad = pl.pallas_call(
        _node_decoder_kernel,
        out_shape=jax.ShapeDtypeStruct((n_al, V_PAD), jnp.float32),
        grid=(steps,),
        in_specs=[pl.BlockSpec((tm, k_pad), lambda i: (i, 0)),
                  full(w1), full(b1), full(wf), full(bf)],
        out_specs=pl.BlockSpec((tm, V_PAD), lambda i: (i, 0)),
        compiler_params=pltpu.CompilerParams(dimension_semantics=("parallel",)),
    )(x, w1, b1, wf, bf)
    logits = logits_pad[:n, :VOCAB]
    log_probs = jax.nn.log_softmax(logits, axis=-1)   # exact f32, fuses with the slice
    return log_probs, logits


def edge_embedding(x_raw, chain_features, edge_p, *, tm_max=TM_MAX):
    """x_raw: (E, 196), chain_features: (E,) int in {0,1} -> h_E (E, HIDDEN) bf16."""
    w1, b1, w2, b2 = edge_p
    e = x_raw.shape[0]
    k_pad = w1.shape[0]
    e_al, tm, steps = _pick_tile(e, tm_max)
    cf = chain_features.astype(x_raw.dtype).reshape(-1, 1)          # 0/1, exact in bf16
    x = jnp.concatenate([x_raw, cf], axis=-1)                        # (E, 197)
    x = jnp.pad(x, ((0, e_al - e), (0, k_pad - x.shape[1]))).astype(jnp.bfloat16)
    full = lambda a: pl.BlockSpec(a.shape, lambda i: (0, 0))
    out = pl.pallas_call(
        _edge_mlp_kernel,
        out_shape=jax.ShapeDtypeStruct((e_al, H_PAD), jnp.bfloat16),
        grid=(steps,),
        in_specs=[pl.BlockSpec((tm, k_pad), lambda i: (i, 0)),
                  full(w1), full(b1), full(w2), full(b2)],
        out_specs=pl.BlockSpec((tm, H_PAD), lambda i: (i, 0)),
        compiler_params=pltpu.CompilerParams(dimension_semantics=("parallel",)),
    )(x, w1, b1, w2, b2)
    return out[:e, :HIDDEN]


# ---------------------------------------------------------------------------
# Parameters (xavier_uniform for dim>1, zero biases — mirrors _init_params)
# ---------------------------------------------------------------------------
def _xavier(key, shape):
    fan_in, fan_out = shape
    bound = (6.0 / (fan_in + fan_out)) ** 0.5
    return jax.random.uniform(key, shape, jnp.float32, -bound, bound)


def make_params(key):
    ks = jax.random.split(key, 8)
    return {
        "node_mlp": (
            _xavier(ks[0], (NODE_IN, HIDDEN)), jnp.zeros((1, HIDDEN), jnp.float32),
            _xavier(ks[1], (HIDDEN, HIDDEN)),  jnp.zeros((1, HIDDEN), jnp.float32),
        ),
        "edge_mlp": (
            _xavier(ks[2], (EDGE_IN, HIDDEN)), jnp.zeros((1, HIDDEN), jnp.float32),
            _xavier(ks[3], (HIDDEN, HIDDEN)),  jnp.zeros((1, HIDDEN), jnp.float32),
        ),
        "chain_emb": _xavier(ks[4], (2, CHAIN_EMB_DIM)),
        "virtual_emb": _xavier(ks[5], (VIRTUAL_VOCAB, HIDDEN)),
        "dec": (_xavier(ks[6], (HIDDEN, VOCAB)), jnp.zeros((1, VOCAB), jnp.float32)),
    }


def pack_params(raw):
    """Fold + pad raw (PyTorch-shaped) params into lane-dense, bf16 kernel params."""
    w1n, b1n, w2n, b2n = raw["node_mlp"]
    wd, bd = raw["dec"]
    # No nonlinearity between the 2nd node-MLP Linear and the decoder Linear (BN is
    # identity at init, StructureEncoder is skipped) -> fold offline in f32.
    # TODO(synk): undo this fold once StructureEncoder is inserted between them.
    wf = w2n @ wd                                   # (H, V)
    bf = b2n @ wd + bd                              # (1, V)

    w1e_full, b1e, w2e, b2e = raw["edge_mlp"]       # w1e_full: (212, H); rows 196: chain part
    # concat(x, emb[cf]) @ W1 == x @ W1[:196] + (emb_table @ W1[196:])[cf]
    chain_bias = raw["chain_emb"] @ w1e_full[EDGE_IN_RAW:]          # (2, H)
    w1e_pad = jnp.zeros((EDGE_K_PAD, H_PAD), jnp.float32)
    w1e_pad = w1e_pad.at[:EDGE_IN_RAW, :HIDDEN].set(w1e_full[:EDGE_IN_RAW])
    # cf (0/1) lives in padded x column 196 -> its W1 row is the chain delta.
    w1e_pad = w1e_pad.at[EDGE_IN_RAW, :HIDDEN].set(chain_bias[1] - chain_bias[0])
    b1e_fold = b1e + chain_bias[0:1]                                # chain-0 folded in

    bf16 = jnp.bfloat16
    return {
        "node_dec": (_pad2(w1n, NODE_K_PAD, H_PAD).astype(bf16),
                     _pad2(b1n, 1, H_PAD),
                     _pad2(wf, H_PAD, V_PAD).astype(bf16),
                     _pad2(bf, 1, V_PAD)),
        "edge": (w1e_pad.astype(bf16),
                 _pad2(b1e_fold, 1, H_PAD),
                 _pad2(w2e, H_PAD, H_PAD).astype(bf16),
                 _pad2(b2e, 1, H_PAD)),
        "virtual_emb": raw["virtual_emb"],
    }


# ---------------------------------------------------------------------------
# Forward pass (mirrors UniIF_Model.forward for dataname='pdb')
# ---------------------------------------------------------------------------
def uniif_forward(params, batch):
    h_V = batch["_V"]                      # (N, 76)
    # TODO(synk): StructureEncoder (geometric message passing over Rigid frames
    # T/T_g/T_ts/T_gs, rbf features, edge_idx, batch_id) is not defined in the provided
    # module source, so the encoder stage is skipped and h_V flows from node_embedding
    # straight into the decoder.  edge_embedding / virtual_embedding / h_E_g / h_E_0
    # exist only to feed it and are therefore not materialized here (pure wasted
    # DMA+MXU work); see edge_embedding() for the Pallas kernel that will feed it.
    log_probs, logits = node_and_decode(h_V, params["node_dec"])
    return {"log_probs": log_probs, "logits": logits}


# ---------------------------------------------------------------------------
# Pure-JAX references (for correctness checks; bf16 MXU inputs => loose tol)
# ---------------------------------------------------------------------------
def _ref_node_decode(raw, x):
    w1, b1, w2, b2 = raw["node_mlp"]
    h = jnp.maximum(x @ w1 + b1, 0.0) @ w2 + b2
    logits = h @ raw["dec"][0] + raw["dec"][1]
    return jax.nn.log_softmax(logits, axis=-1), logits


def _ref_edge(raw, x_raw, cf):
    w1, b1, w2, b2 = raw["edge_mlp"]
    x = jnp.concatenate([x_raw, raw["chain_emb"][cf]], axis=-1)
    return jnp.maximum(x @ w1 + b1, 0.0) @ w2 + b2


# ---------------------------------------------------------------------------
if __name__ == "__main__":
    key = jax.random.PRNGKey(0)
    k_par, k_v, k_e, k_c, k_vg = jax.random.split(key, 5)

    raw = make_params(k_par)
    params = pack_params(raw)

    N, E, N_G, E_G = 8, 16, 6, 6   # nodes, edges, virtual nodes, global edges
    batch = {
        "_V": jax.random.normal(k_v, (N, NODE_IN), jnp.float32),
        "_E": jax.random.normal(k_e, (E, EDGE_IN_RAW), jnp.float32),
        "chain_features": jax.random.randint(k_c, (E,), 0, 2),
        "_V_g": jax.random.randint(k_vg, (N_G,), 0, VIRTUAL_VOCAB),
        "edge_idx_g": jnp.stack(
            [jnp.arange(E_G, dtype=jnp.int32), jnp.zeros((E_G,), jnp.int32)]),
        # Rigid-frame inputs (T_rot/T_trans, rbf_ts, ...) are only consumed by the
        # skipped StructureEncoder and are omitted from this synthetic batch.
    }

    out = uniif_forward(params, batch)
    jax.block_until_ready(out)

    log_probs, logits = out["log_probs"], out["logits"]
    assert log_probs.shape == (N, VOCAB) and logits.shape == (N, VOCAB)
    assert bool(jnp.all(jnp.isfinite(log_probs))) and bool(jnp.all(jnp.isfinite(logits)))
    # log_softmax sanity: rows of exp(log_probs) sum to 1 (exact f32 wrapper math)
    assert bool(jnp.allclose(jnp.sum(jnp.exp(log_probs), axis=-1), 1.0, atol=1e-5))
    # match f32 reference up to bf16 MXU-input rounding
    ref_lp, ref_lg = _ref_node_decode(raw, batch["_V"])
    assert bool(jnp.allclose(logits, ref_lg, atol=2e-1))
    assert bool(jnp.allclose(log_probs, ref_lp, atol=2e-1))

    # Exercise the edge-embedding kernel (feeds the skipped StructureEncoder).
    h_E = edge_embedding(batch["_E"], batch["chain_features"], params["edge"])
    jax.block_until_ready(h_E)
    assert h_E.shape == (E, HIDDEN) and bool(jnp.all(jnp.isfinite(h_E.astype(jnp.float32))))
    assert bool(jnp.allclose(h_E.astype(jnp.float32),
                             _ref_edge(raw, batch["_E"], batch["chain_features"]),
                             atol=2e-1))

    print("KERNEL_OK")
</pallas_src>

<mosaic_0001>
module attributes {stable_mosaic.version = 11 : i64} {
  func.func @_node_decoder_kernel(%arg0: i32, %arg1: memref<16x128xbf16, #tpu.memory_space<vmem>>, %arg2: memref<128x128xbf16, #tpu.memory_space<vmem>>, %arg3: memref<1x128xf32, #tpu.memory_space<vmem>>, %arg4: memref<128x128xbf16, #tpu.memory_space<vmem>>, %arg5: memref<1x128xf32, #tpu.memory_space<vmem>>, %arg6: memref<16x128xf32, #tpu.memory_space<vmem>>) attributes {dimension_semantics = [#tpu.dimension_semantics<parallel>], iteration_bounds = array<i64: 1>, scalar_prefetch = 0 : i64, scratch_operands = 0 : i64, tpu.core_type = #tpu.core_type<tc>, window_params = [{transform_indices = @transform_0, window_bounds = array<i64: 16, 128>}, {pipeline_mode = #tpu.pipeline_mode<synchronous>, transform_indices = @transform_1, window_bounds = array<i64: 128, 128>}, {pipeline_mode = #tpu.pipeline_mode<synchronous>, transform_indices = @transform_2, window_bounds = array<i64: 1, 128>}, {pipeline_mode = #tpu.pipeline_mode<synchronous>, transform_indices = @transform_3, window_bounds = array<i64: 128, 128>}, {pipeline_mode = #tpu.pipeline_mode<synchronous>, transform_indices = @transform_4, window_bounds = array<i64: 1, 128>}, {transform_indices = @transform_5, window_bounds = array<i64: 16, 128>}]} {
    %c0 = arith.constant 0 : index
    %c0_0 = arith.constant 0 : index
    %0 = vector.load %arg1[%c0, %c0_0] : memref<16x128xbf16, #tpu.memory_space<vmem>>, vector<16x128xbf16>
    %c0_1 = arith.constant 0 : index
    %c0_2 = arith.constant 0 : index
    %1 = vector.load %arg2[%c0_1, %c0_2] : memref<128x128xbf16, #tpu.memory_space<vmem>>, vector<128x128xbf16>
    %cst = arith.constant dense<0.000000e+00> : vector<16x128xf32>
    %2 = tpu.matmul %0, %1, %cst {dimension_numbers = #tpu.dot_dimension_numbers<[1], [0], [0], [1], [0, 0, 1, 1], [], []>} : vector<16x128xbf16>, vector<128x128xbf16>, vector<16x128xf32> -> vector<16x128xf32>
    %c0_3 = arith.constant 0 : index
    %c0_4 = arith.constant 0 : index
    %3 = vector.load %arg3[%c0_3, %c0_4] : memref<1x128xf32, #tpu.memory_space<vmem>>, vector<1x128xf32>
    %4 = vector.broadcast %3 : vector<1x128xf32> to vector<16x128xf32>
    %5 = arith.addf %2, %4 : vector<16x128xf32>
    %cst_5 = arith.constant 0.000000e+00 : f32
    %6 = vector.broadcast %cst_5 : f32 to vector<16x128xf32>
    %7 = arith.maximumf %5, %6 : vector<16x128xf32>
    %8 = arith.truncf %7 : vector<16x128xf32> to vector<16x128xbf16>
    %c0_6 = arith.constant 0 : index
    %c0_7 = arith.constant 0 : index
    %9 = vector.load %arg4[%c0_6, %c0_7] : memref<128x128xbf16, #tpu.memory_space<vmem>>, vector<128x128xbf16>
    %cst_8 = arith.constant dense<0.000000e+00> : vector<16x128xf32>
    %10 = tpu.matmul %8, %9, %cst_8 {dimension_numbers = #tpu.dot_dimension_numbers<[1], [0], [0], [1], [0, 0, 1, 1], [], []>} : vector<16x128xbf16>, vector<128x128xbf16>, vector<16x128xf32> -> vector<16x128xf32>
    %c0_9 = arith.constant 0 : index
    %c0_10 = arith.constant 0 : index
    %11 = vector.load %arg5[%c0_9, %c0_10] : memref<1x128xf32, #tpu.memory_space<vmem>>, vector<1x128xf32>
    %12 = vector.broadcast %11 : vector<1x128xf32> to vector<16x128xf32>
    %13 = arith.addf %10, %12 : vector<16x128xf32>
    %c0_11 = arith.constant 0 : index
    %c0_12 = arith.constant 0 : index
    %14 = vector.load %arg6[%c0_11, %c0_12] : memref<16x128xf32, #tpu.memory_space<vmem>>, vector<16x128xf32>
    tpu.vector_store %arg6[%c0_11, %c0_12], %13 {strides = array<i32>} : memref<16x128xf32, #tpu.memory_space<vmem>>, vector<16x128xf32>,
    return
  }
  func.func @transform_0(%arg0: i32) -> (i32, i32) {
    %c0_i32 = arith.constant 0 : i32
    %c0_i32_0 = arith.constant 0 : i32
    return %arg0, %c0_i32 : i32, i32
  }
  func.func @transform_1(%arg0: i32) -> (i32, i32) {
    %c0_i32 = arith.constant 0 : i32
    %c0_i32_0 = arith.constant 0 : i32
    %c0_i32_1 = arith.constant 0 : i32
    return %c0_i32, %c0_i32_0 : i32, i32
  }
  func.func @transform_2(%arg0: i32) -> (i32, i32) {
    %c0_i32 = arith.constant 0 : i32
    %c0_i32_0 = arith.constant 0 : i32
    %c0_i32_1 = arith.constant 0 : i32
    return %c0_i32, %c0_i32_0 : i32, i32
  }
  func.func @transform_3(%arg0: i32) -> (i32, i32) {
    %c0_i32 = arith.constant 0 : i32
    %c0_i32_0 = arith.constant 0 : i32
    %c0_i32_1 = arith.constant 0 : i32
    return %c0_i32, %c0_i32_0 : i32, i32
  }
  func.func @transform_4(%arg0: i32) -> (i32, i32) {
    %c0_i32 = arith.constant 0 : i32
    %c0_i32_0 = arith.constant 0 : i32
    %c0_i32_1 = arith.constant 0 : i32
    return %c0_i32, %c0_i32_0 : i32, i32
  }
  func.func @transform_5(%arg0: i32) -> (i32, i32) {
    %c0_i32 = arith.constant 0 : i32
    %c0_i32_0 = arith.constant 0 : i32
    return %arg0, %c0_i32 : i32, i32
  }
}

</mosaic_0001>

<bundles_post_ra>
// kernel: tpu_custom_call.1
= control target key start
LH: loop header
LB: loop body
LE: loop exit
PB: predicated region body
PF: predicated region fallthrough
CT: control target
= control target key end

     0   :  { %10 = vsyncpa [#allocation3], 0  ;;  %s566_s0 = inlined_call_operand.hbm [shape: bf16[16,128], index: 0, kind: input, shape index: {}]   ;;  %s567_s1 = inlined_call_operand.hbm [shape: bf16[128,128], index: 1, kind: input, shape index: {}]   ;;  %s568_s2 = inlined_call_operand.vmem [shape: f32[1,128], index: 2, kind: input, shape index: {}]   ;;  %s569_s3 = inlined_call_operand.hbm [shape: bf16[128,128], index: 3, kind: input, shape index: {}]   ;;  %s570_s4 = inlined_call_operand.vmem [shape: f32[1,128], index: 4, kind: input, shape index: {}]   ;;  %s571_s5 = inlined_call_operand.hbm [shape: f32[16,128], index: 5, kind: output, shape index: {}]  }
   0x1   :  { %11 = vsyncpa [#allocation6], 0 }
   0x2   :  { %12 = vsyncpa [#allocation4], 0  ;;  %s508_s18 = smov [#allocation5]   ;;  %s509_s20 = smov [#allocation2]  }
   0x3   :  { %s30_s19 = sshll.u32 %s508_s18, 4  ;;  %s18_s21 = sshll.u32 %s509_s20, 4  ;;  %s31_s19 = int_to_ptr.vmem [resolvable:$true] %s30_s19  ;;  %s19_s21 = int_to_ptr.vmem [resolvable:$true] %s18_s21 }
   0x4   :  { %s430_s22 = scalar_lea.vmem %s31_s19, 1024  ;;  %p435_p1 = scmp.lt.s32.totalorder %s31_s19, %s31_s19 }
   0x5   :  { %p431_p0 = scmp.ne.s32.totalorder %s31_s19, %s430_s22  ;;  %p436_p2 = scmp.lt.s32.totalorder %s430_s22, %s430_s22 }
   0x7   :  { %p437_p3 = por %p436_p2, %p435_p1 }
   0x9   :  { %p438_p4 = pnand %p437_p3, %p431_p0 }
   0xb   :  { %441 = shalt.err (!%p438_p4)
}
   0xc   :  { %s510_s23 = smov 64   ;;  %s511_s24 = smov 4  }
   0xd   :  { %36 = dma.hbm_to_vmem [thread:$0]  %s567_s1, 1024, %s31_s19, [#allocation6], %s510_s23, %s510_s23, %s511_s24  }
   0xe   :  { %s450_s27 = scalar_lea.vmem %s19_s21, 128  ;;  %p455_p6 = scmp.lt.s32.totalorder %s19_s21, %s19_s21 }
   0xf   :  { %p451_p5 = scmp.ne.s32.totalorder %s19_s21, %s450_s27  ;;  %p456_p7 = scmp.lt.s32.totalorder %s450_s27, %s450_s27 }
  0x11   :  { %p457_p8 = por %p456_p7, %p455_p6 }
  0x13   :  { %p458_p9 = pnand %p457_p8, %p451_p5 }
  0x15   :  { %461 = shalt.err (!%p458_p9)
}
  0x16   :  { %24 = dma.hbm_to_vmem [thread:$0]  %s566_s0, 128, %s19_s21, [#allocation3], %s510_s23, %s510_s23, %s511_s24  }
  0x17   :  { %s512_s30 = smov [#allocation7]  }
  0x18   :  { %s44_s6 = sshll.u32 %s512_s30, 4  ;;  %s45_s6 = int_to_ptr.vmem [resolvable:$true] %s44_s6 }
  0x19   :  { %s470_s7 = scalar_lea.vmem %s45_s6, 1024  ;;  %p475_p11 = scmp.lt.s32.totalorder %s45_s6, %s45_s6 }
  0x1a   :  { %p471_p10 = scmp.ne.s32.totalorder %s45_s6, %s470_s7  ;;  %p476_p12 = scmp.lt.s32.totalorder %s470_s7, %s470_s7 }
  0x1c   :  { %p477_p13 = por %p476_p12, %p475_p11 }
  0x1e   :  { %p478_p0 = pnand %p477_p13, %p471_p10 }
  0x20   :  { %481 = shalt.err (!%p478_p0)
}
  0x21   :  { %50 = dma.hbm_to_vmem [thread:$0]  %s569_s3, 1024, %s45_s6, [#allocation6], %s510_s23, %s510_s23, %s511_s24  }
  0x22   :  { %502 = dma.done.wait [#allocation3], 128  }
  0x23   :  { %503 = vsyncadd [#allocation3], 4294967168 }
  0x24   :  { %504 = dma.done.wait [#allocation6], 2048  }
  0x25   :  { %505 = vsyncadd [#allocation6], 4294965248  ;;  %v513_v0 = vmov 0.0   ;;  %vm514_vm0 = vmmov 0   ;;  %v405_v1 = vld [vmem:[#allocation5 + $0x38] sm:$0xff]   ;;  %v406_v2 = vld [vmem:[#allocation5 + $0x30] sm:$0xff]  }
  0x26   :  { %355 = vmatprep.subr.bf16.mxu0 %v513_v0  ;;  %371 = vmatprep.mubr.msk.bf16.mxu0 %vm514_vm0, %v513_v0  ;;  %v407_v3 = vld [vmem:[#allocation5 + $0x28] sm:$0xff]   ;;  %v414_v4 = vld [vmem:[#allocation7 + $0x38] sm:$0xff]   ;;  %v408_v5 = vld [vmem:[#allocation5 + $0x20] sm:$0xff]   ;;  %s515_s11 = smov [#allocation8]  }
  0x27   :  { %375 = vmatprep.subr.bf16.mxu1 %v513_v0  ;;  %391 = vmatprep.mubr.msk.bf16.mxu1 %vm514_vm0, %v513_v0  ;;  %v415_v6 = vld [vmem:[#allocation7 + $0x30] sm:$0xff]   ;;  %v409_v7 = vld [vmem:[#allocation5 + $0x18] sm:$0xff]   ;;  %v416_v8 = vld [vmem:[#allocation7 + $0x28] sm:$0xff]   ;;  %s305_s12 = sshll.u32 %s515_s11, 4  ;;  %s306_s12 = int_to_ptr.vmem [resolvable:$true] %s305_s12 }
  0x28   :  { %356 = vmatpush3.bf16.msra.mxu0 %v405_v1  ;;  %376 = vmatpush3.bf16.msra.mxu1 %v414_v4  ;;  %v410_v9 = vld [vmem:[#allocation5 + $0x10] sm:$0xff]   ;;  %v417_v10 = vld [vmem:[#allocation7 + $0x20] sm:$0xff]   ;;  %v411_v11 = vld [vmem:[#allocation5 + $0x8] sm:$0xff]   ;;  %p487_p2 = scmp.lt.s32.totalorder %s306_s12, %s306_s12 }
  0x29   :  { %357 = vmatprep.subr.bf16.mxu0 %v513_v0  ;;  %377 = vmatprep.subr.bf16.mxu1 %v513_v0  ;;  %v418_v12 = vld [vmem:[#allocation7 + $0x18] sm:$0xff]   ;;  %v412_v13 = vld [vmem:[#allocation5] sm:$0xff]   ;;  %v419_v15 = vld [vmem:[#allocation7 + $0x10] sm:$0xff]  }
  0x2a   :  { %v413_v14 = vld [vmem:[#allocation2] sm:$0xff]   ;;  %v420_v16 = vld [vmem:[#allocation7 + $0x8] sm:$0xff]   ;;  %v421_v17 = vld [vmem:[#allocation7] sm:$0xff]  }
  0x2b   :  { %v318_v18 = vld [vmem:[%s568_s2] ss:$0 sm:$0xff]  ;;  %s482_s2 = scalar_lea.vmem %s306_s12, 256 }
  0x2c   :  { %358 = vmatpush3.bf16.msra.mxu0 %v406_v2  ;;  %378 = vmatpush3.bf16.msra.mxu1 %v415_v6  ;;  %v328_v28 = vld [vmem:[%s570_s4] ss:$0 sm:$0xff]  ;;  %p483_p1 = scmp.ne.s32.totalorder %s306_s12, %s482_s2  ;;  %p488_p3 = scmp.lt.s32.totalorder %s482_s2, %s482_s2 }
  0x2d   :  { %359 = vmatprep.subr.bf16.mxu0 %v513_v0  ;;  %379 = vmatprep.subr.bf16.mxu1 %v513_v0 }
  0x2e   :  { %p489_p4 = por %p488_p3, %p487_p2 }
  0x30   :  { %360 = vmatpush3.bf16.msra.mxu0 %v407_v3  ;;  %380 = vmatpush3.bf16.msra.mxu1 %v416_v8  ;;  %p490_p5 = pnand %p489_p4, %p483_p1 }
  0x31   :  { %361 = vmatprep.subr.bf16.mxu0 %v513_v0  ;;  %381 = vmatprep.subr.bf16.mxu1 %v513_v0 }
  0x34   :  { %362 = vmatpush3.bf16.msra.mxu0 %v408_v5  ;;  %382 = vmatpush3.bf16.msra.mxu1 %v417_v10 }
  0x35   :  { %363 = vmatprep.subr.bf16.mxu0 %v513_v0  ;;  %383 = vmatprep.subr.bf16.mxu1 %v513_v0 }
  0x38   :  { %364 = vmatpush3.bf16.msra.mxu0 %v409_v7  ;;  %384 = vmatpush3.bf16.msra.mxu1 %v418_v12 }
  0x39   :  { %365 = vmatprep.subr.bf16.mxu0 %v513_v0  ;;  %385 = vmatprep.subr.bf16.mxu1 %v513_v0 }
  0x3c   :  { %366 = vmatpush3.bf16.msra.mxu0 %v410_v9  ;;  %386 = vmatpush3.bf16.msra.mxu1 %v419_v15 }
  0x3d   :  { %367 = vmatprep.subr.bf16.mxu0 %v513_v0  ;;  %387 = vmatprep.subr.bf16.mxu1 %v513_v0 }
  0x40   :  { %368 = vmatpush3.bf16.msra.mxu0 %v411_v11  ;;  %388 = vmatpush3.bf16.msra.mxu1 %v420_v16 }
  0x41   :  { %369 = vmatprep.subr.bf16.mxu0 %v513_v0  ;;  %389 = vmatprep.subr.bf16.mxu1 %v513_v0 }
  0x44   :  { %370 = vmatpush3.bf16.msra.mxu0 %v412_v13  ;;  %390 = vmatpush3.bf16.msra.mxu1 %v421_v17 }
  0x47   :  { %372 = vmatmul.mubr.bf16.vlgmr.msra.gmra.mxu0 %v413_v14 }
 0x107   :  { %v176_v19 = vpop.f32.mrf.mxu0 }
 0x108   :  { %v177_v21 = vadd.f32 %v318_v18, %v176_v19 }
 0x109   :  { %v373_v20 = vpop.f32.mrf.mxu0 }
 0x10a   :  { %v183_v25 = vmax.f32 %v177_v21, 0.0 }
 0x10b   :  { %v179_v22 = vpop.f32.mrf.mxu0 }
 0x10c   :  { %v180_v23 = vadd.f32 %v318_v18, %v179_v22 }
 0x10d   :  { %v374_v24 = vpop.f32.mrf.mxu0 }
 0x10e   :  { %v184_v26 = vmax.f32 %v180_v23, 0.0 }
 0x110   :  { %v185_v27 = vpack.c.bf16 %v184_v26, %v183_v25 }
 0x112   :  { %392 = vmatmul.mubr.bf16.vlgmr.msra.gmra.mxu1 %v185_v27 }
 0x1d2   :  { %v291_v29 = vpop.f32.mrf.mxu1 }
 0x1d3   :  { %v292_v30 = vadd.f32 %v328_v28, %v291_v29 }
 0x1d4   :  { %v393_v31 = vpop.f32.mrf.mxu1 }
 0x1d5   :  { %298 = vst [vmem:[#allocation8] sm:$0xff] %v292_v30 }
 0x1d6   :  { %v294_v32 = vpop.f32.mrf.mxu1 }
 0x1d7   :  { %v295_v33 = vadd.f32 %v328_v28, %v294_v32 }
 0x1d8   :  { %v394_v34 = vpop.f32.mrf.mxu1 }
 0x1d9   :  { %299 = vst [vmem:[#allocation8 + $0x8] sm:$0xff] %v295_v33 }
 0x1da   :  { %493 = shalt.err (!%p490_p5)
}
 0x1db   :  { %s516_s13 = smov 128   ;;  %s517_s4 = smov 8  }
 0x1dc   :  { %311 = dma.vmem_to_hbm [thread:$0]  %s306_s12, 256, %s571_s5, [#allocation4], %s516_s13, %s516_s13, %s517_s4  }
 0x1dd   :  { %506 = dma.done.wait [#allocation4], 256  }
 0x1de   :  { %507 = vsyncadd [#allocation4], 4294967040 }
 0x1df   :  { %315 = vsyncpa [#allocation3], 1 }
 0x1e0   :  { %316 = vsyncpa [#allocation6], 1 }
 0x1e1   :  { %317 = vsyncpa [#allocation4], 1 }

</bundles_post_ra>
